<compile_context>
chip_gen: v7x
topology: tpu7x:2x2x1
jax: 0.10.0
libtpu: 0.0.40
codegen_flags: <defaults>
</compile_context>

<pallas_src>
import functools

import jax
import jax.numpy as jnp
from jax.experimental import pallas as pl
from jax.experimental.pallas import tpu as pltpu

LANE = 128  # TPU lane width; output head padded to this many columns


def critic_kernel(x_ref, w0_ref, b0_ref, w1_ref, b1_ref, w2_ref, b2_ref, out_ref):
    # Layer 0: Linear(state_dim + action_dim, h0) + ReLU  (single dot on concat input)
    h = jnp.dot(x_ref[...], w0_ref[...], preferred_element_type=jnp.float32) + b0_ref[...]
    h = jnp.maximum(h, 0.0)
    # Layer 1: Linear(h0, h1) + ReLU
    h = jnp.dot(h, w1_ref[...], preferred_element_type=jnp.float32) + b1_ref[...]
    h = jnp.maximum(h, 0.0)
    # Layer 2 (output head): Linear(h1, 1), zero-padded to 128 lanes -> lane-dense store
    out = jnp.dot(h, w2_ref[...], preferred_element_type=jnp.float32) + b2_ref[...]
    out_ref[...] = out.astype(out_ref.dtype)


def prepare_params(params):
    """One-time preprocessing (hoisted out of the hot path).

    params = (W0, b0, W1, b1, W2, b2) with weights in (in, out) layout
    (i.e. forward is y = x @ W + b, equivalent to PyTorch x @ W.T + b).
    Returns kernel-ready tensors: biases as (1, H) rows, head padded to 128 lanes.
    """
    w0, b0, w1, b1, w2, b2 = params
    h1 = w2.shape[0]
    w2p = jnp.zeros((h1, LANE), jnp.float32).at[:, :1].set(w2.astype(jnp.float32))
    b2p = jnp.zeros((1, LANE), jnp.float32).at[:, :1].set(b2.reshape(1, -1).astype(jnp.float32))
    return (w0.astype(jnp.float32),
            b0.reshape(1, -1).astype(jnp.float32),
            w1.astype(jnp.float32),
            b1.reshape(1, -1).astype(jnp.float32),
            w2p, b2p)


def _pick_batch_tile(batch):
    # 128-multiple tiles when possible (good on v5e/v6e/v7x); otherwise the
    # largest 8-multiple divisor; otherwise the full batch (always legal).
    for tb in (512, 256, 128, 64, 32, 16, 8):
        if batch % tb == 0:
            return tb
    return batch


@functools.partial(jax.jit, static_argnames=())
def critic_forward(state, action, prepared):
    """Forward pass of the Critic: cat(state, action) -> MLP -> (B, 1)."""
    w0, b0, w1, b1, w2p, b2p = prepared

    xcat = jnp.concatenate([state.astype(jnp.float32),
                            action.astype(jnp.float32)], axis=1)
    batch, d_in = xcat.shape
    h0 = w0.shape[1]
    h1 = w1.shape[1]

    tb = _pick_batch_tile(batch)
    grid = (pl.cdiv(batch, tb),)

    # Activations/outputs tiled on batch; weights/biases use a constant block
    # index so they are DMA'd once and stay resident in VMEM across grid steps.
    in_specs = [
        pl.BlockSpec((tb, d_in), lambda i: (i, 0)),    # concat(state, action)
        pl.BlockSpec((d_in, h0), lambda i: (0, 0)),    # W0
        pl.BlockSpec((1, h0), lambda i: (0, 0)),       # b0
        pl.BlockSpec((h0, h1), lambda i: (0, 0)),      # W1
        pl.BlockSpec((1, h1), lambda i: (0, 0)),       # b1
        pl.BlockSpec((h1, LANE), lambda i: (0, 0)),    # W2 (padded to 128 lanes)
        pl.BlockSpec((1, LANE), lambda i: (0, 0)),     # b2 (padded to 128 lanes)
    ]
    out_spec = pl.BlockSpec((tb, LANE), lambda i: (i, 0))

    out_padded = pl.pallas_call(
        critic_kernel,
        out_shape=jax.ShapeDtypeStruct((batch, LANE), jnp.float32),
        grid=grid,
        in_specs=in_specs,
        out_specs=out_spec,
        compiler_params=pltpu.CompilerParams(
            dimension_semantics=("parallel",)),
    )(xcat, w0, b0, w1, b1, w2p, b2p)

    # Only column 0 carries the real head output (rest is zero padding).
    return out_padded[:, :1]


def init_linear(key, fan_in, fan_out):
    """PyTorch nn.Linear default init: U(-1/sqrt(fan_in), 1/sqrt(fan_in))."""
    kw, kb = jax.random.split(key)
    bound = 1.0 / jnp.sqrt(jnp.float32(fan_in))
    w = jax.random.uniform(kw, (fan_in, fan_out), jnp.float32, -bound, bound)
    b = jax.random.uniform(kb, (fan_out,), jnp.float32, -bound, bound)
    return w, b


if __name__ == "__main__":
    # Small shapes consistent with Critic(state_dim, action_dim, hidden_layers=[32, 32])
    batch = 8
    state_dim = 12
    action_dim = 4
    hidden_layers = [32, 32]

    key = jax.random.PRNGKey(0)
    k_x, k_a, k_l0, k_l1, k_l2 = jax.random.split(key, 5)

    state = jax.random.normal(k_x, (batch, state_dim), jnp.float32)
    action = jax.random.normal(k_a, (batch, action_dim), jnp.float32)

    # Layers exactly as the PyTorch __init__ builds them for len(hidden_layers)==2:
    #   Linear(state+action, h0), Linear(h0, h1), Linear(h1, 1)
    w0, b0 = init_linear(k_l0, state_dim + action_dim, hidden_layers[0])
    w1, b1 = init_linear(k_l1, hidden_layers[0], hidden_layers[1])
    w2, b2 = init_linear(k_l2, hidden_layers[1], 1)

    prepared = prepare_params((w0, b0, w1, b1, w2, b2))  # one-time preprocessing
    prepared = jax.block_until_ready(prepared)

    out = critic_forward(state, action, prepared)
    out = jax.block_until_ready(out)

    # Pure-JAX reference (mirrors the PyTorch forward)
    xcat = jnp.concatenate([state, action], axis=1)
    h = jnp.maximum(xcat @ w0 + b0, 0.0)
    h = jnp.maximum(h @ w1 + b1, 0.0)
    ref = h @ w2 + b2

    assert out.shape == (batch, 1)
    assert jnp.allclose(out, ref, atol=1e-4, rtol=1e-4)
    print("KERNEL_OK")
</pallas_src>

<mosaic_0001>
module attributes {stable_mosaic.version = 11 : i64} {
  func.func @critic_kernel(%arg0: i32, %arg1: memref<8x16xf32, #tpu.memory_space<vmem>>, %arg2: memref<16x32xf32, #tpu.memory_space<vmem>>, %arg3: memref<1x32xf32, #tpu.memory_space<vmem>>, %arg4: memref<32x32xf32, #tpu.memory_space<vmem>>, %arg5: memref<1x32xf32, #tpu.memory_space<vmem>>, %arg6: memref<32x128xf32, #tpu.memory_space<vmem>>, %arg7: memref<1x128xf32, #tpu.memory_space<vmem>>, %arg8: memref<8x128xf32, #tpu.memory_space<vmem>>) attributes {dimension_semantics = [#tpu.dimension_semantics<parallel>], iteration_bounds = array<i64: 1>, scalar_prefetch = 0 : i64, scratch_operands = 0 : i64, tpu.core_type = #tpu.core_type<tc>, window_params = [{transform_indices = @transform_0, window_bounds = array<i64: 8, 16>}, {pipeline_mode = #tpu.pipeline_mode<synchronous>, transform_indices = @transform_1, window_bounds = array<i64: 16, 32>}, {pipeline_mode = #tpu.pipeline_mode<synchronous>, transform_indices = @transform_2, window_bounds = array<i64: 1, 32>}, {pipeline_mode = #tpu.pipeline_mode<synchronous>, transform_indices = @transform_3, window_bounds = array<i64: 32, 32>}, {pipeline_mode = #tpu.pipeline_mode<synchronous>, transform_indices = @transform_4, window_bounds = array<i64: 1, 32>}, {pipeline_mode = #tpu.pipeline_mode<synchronous>, transform_indices = @transform_5, window_bounds = array<i64: 32, 128>}, {pipeline_mode = #tpu.pipeline_mode<synchronous>, transform_indices = @transform_6, window_bounds = array<i64: 1, 128>}, {transform_indices = @transform_7, window_bounds = array<i64: 8, 128>}]} {
    %c0 = arith.constant 0 : index
    %c0_0 = arith.constant 0 : index
    %0 = vector.load %arg1[%c0, %c0_0] : memref<8x16xf32, #tpu.memory_space<vmem>>, vector<8x16xf32>
    %c0_1 = arith.constant 0 : index
    %c0_2 = arith.constant 0 : index
    %1 = vector.load %arg2[%c0_1, %c0_2] : memref<16x32xf32, #tpu.memory_space<vmem>>, vector<16x32xf32>
    %cst = arith.constant dense<0.000000e+00> : vector<8x32xf32>
    %2 = tpu.matmul %0, %1, %cst {dimension_numbers = #tpu.dot_dimension_numbers<[1], [0], [0], [1], [0, 0, 1, 1], [], []>} : vector<8x16xf32>, vector<16x32xf32>, vector<8x32xf32> -> vector<8x32xf32>
    %c0_3 = arith.constant 0 : index
    %c0_4 = arith.constant 0 : index
    %3 = vector.load %arg3[%c0_3, %c0_4] : memref<1x32xf32, #tpu.memory_space<vmem>>, vector<1x32xf32>
    %4 = vector.broadcast %3 : vector<1x32xf32> to vector<8x32xf32>
    %5 = arith.addf %2, %4 : vector<8x32xf32>
    %cst_5 = arith.constant 0.000000e+00 : f32
    %6 = vector.broadcast %cst_5 : f32 to vector<8x32xf32>
    %7 = arith.maximumf %5, %6 : vector<8x32xf32>
    %c0_6 = arith.constant 0 : index
    %c0_7 = arith.constant 0 : index
    %8 = vector.load %arg4[%c0_6, %c0_7] : memref<32x32xf32, #tpu.memory_space<vmem>>, vector<32x32xf32>
    %cst_8 = arith.constant dense<0.000000e+00> : vector<8x32xf32>
    %9 = tpu.matmul %7, %8, %cst_8 {dimension_numbers = #tpu.dot_dimension_numbers<[1], [0], [0], [1], [0, 0, 1, 1], [], []>} : vector<8x32xf32>, vector<32x32xf32>, vector<8x32xf32> -> vector<8x32xf32>
    %c0_9 = arith.constant 0 : index
    %c0_10 = arith.constant 0 : index
    %10 = vector.load %arg5[%c0_9, %c0_10] : memref<1x32xf32, #tpu.memory_space<vmem>>, vector<1x32xf32>
    %11 = vector.broadcast %10 : vector<1x32xf32> to vector<8x32xf32>
    %12 = arith.addf %9, %11 : vector<8x32xf32>
    %cst_11 = arith.constant 0.000000e+00 : f32
    %13 = vector.broadcast %cst_11 : f32 to vector<8x32xf32>
    %14 = arith.maximumf %12, %13 : vector<8x32xf32>
    %c0_12 = arith.constant 0 : index
    %c0_13 = arith.constant 0 : index
    %15 = vector.load %arg6[%c0_12, %c0_13] : memref<32x128xf32, #tpu.memory_space<vmem>>, vector<32x128xf32>
    %cst_14 = arith.constant dense<0.000000e+00> : vector<8x128xf32>
    %16 = tpu.matmul %14, %15, %cst_14 {dimension_numbers = #tpu.dot_dimension_numbers<[1], [0], [0], [1], [0, 0, 1, 1], [], []>} : vector<8x32xf32>, vector<32x128xf32>, vector<8x128xf32> -> vector<8x128xf32>
    %c0_15 = arith.constant 0 : index
    %c0_16 = arith.constant 0 : index
    %17 = vector.load %arg7[%c0_15, %c0_16] : memref<1x128xf32, #tpu.memory_space<vmem>>, vector<1x128xf32>
    %18 = vector.broadcast %17 : vector<1x128xf32> to vector<8x128xf32>
    %19 = arith.addf %16, %18 : vector<8x128xf32>
    %c0_17 = arith.constant 0 : index
    %c0_18 = arith.constant 0 : index
    %20 = vector.load %arg8[%c0_17, %c0_18] : memref<8x128xf32, #tpu.memory_space<vmem>>, vector<8x128xf32>
    tpu.vector_store %arg8[%c0_17, %c0_18], %19 {strides = array<i32>} : memref<8x128xf32, #tpu.memory_space<vmem>>, vector<8x128xf32>,
    return
  }
  func.func @transform_0(%arg0: i32) -> (i32, i32) {
    %c0_i32 = arith.constant 0 : i32
    %c0_i32_0 = arith.constant 0 : i32
    return %arg0, %c0_i32 : i32, i32
  }
  func.func @transform_1(%arg0: i32) -> (i32, i32) {
    %c0_i32 = arith.constant 0 : i32
    %c0_i32_0 = arith.constant 0 : i32
    %c0_i32_1 = arith.constant 0 : i32
    return %c0_i32, %c0_i32_0 : i32, i32
  }
  func.func @transform_2(%arg0: i32) -> (i32, i32) {
    %c0_i32 = arith.constant 0 : i32
    %c0_i32_0 = arith.constant 0 : i32
    %c0_i32_1 = arith.constant 0 : i32
    return %c0_i32, %c0_i32_0 : i32, i32
  }
  func.func @transform_3(%arg0: i32) -> (i32, i32) {
    %c0_i32 = arith.constant 0 : i32
    %c0_i32_0 = arith.constant 0 : i32
    %c0_i32_1 = arith.constant 0 : i32
    return %c0_i32, %c0_i32_0 : i32, i32
  }
  func.func @transform_4(%arg0: i32) -> (i32, i32) {
    %c0_i32 = arith.constant 0 : i32
    %c0_i32_0 = arith.constant 0 : i32
    %c0_i32_1 = arith.constant 0 : i32
    return %c0_i32, %c0_i32_0 : i32, i32
  }
  func.func @transform_5(%arg0: i32) -> (i32, i32) {
    %c0_i32 = arith.constant 0 : i32
    %c0_i32_0 = arith.constant 0 : i32
    %c0_i32_1 = arith.constant 0 : i32
    return %c0_i32, %c0_i32_0 : i32, i32
  }
  func.func @transform_6(%arg0: i32) -> (i32, i32) {
    %c0_i32 = arith.constant 0 : i32
    %c0_i32_0 = arith.constant 0 : i32
    %c0_i32_1 = arith.constant 0 : i32
    return %c0_i32, %c0_i32_0 : i32, i32
  }
  func.func @transform_7(%arg0: i32) -> (i32, i32) {
    %c0_i32 = arith.constant 0 : i32
    %c0_i32_0 = arith.constant 0 : i32
    return %arg0, %c0_i32 : i32, i32
  }
}

</mosaic_0001>

<bundles_post_ra>
// kernel: critic_forward.1
= control target key start
LH: loop header
LB: loop body
LE: loop exit
PB: predicated region body
PF: predicated region fallthrough
CT: control target
= control target key end

     0   :  { %12 = vsyncpa [#allocation3], 0  ;;  %s394_s24 = smov [#allocation2]   ;;  %s488_s0 = inlined_call_operand.vmem [shape: f32[8,16], index: 0, kind: input, shape index: {}]   ;;  %s489_s1 = inlined_call_operand.vmem [shape: f32[16,32], index: 1, kind: input, shape index: {}]   ;;  %s490_s2 = inlined_call_operand.vmem [shape: f32[1,32], index: 2, kind: input, shape index: {}]   ;;  %s491_s3 = inlined_call_operand.vmem [shape: f32[32,32], index: 3, kind: input, shape index: {}]   ;;  %s492_s4 = inlined_call_operand.vmem [shape: f32[1,32], index: 4, kind: input, shape index: {}]   ;;  %s493_s5 = inlined_call_operand.hbm [shape: f32[32,128], index: 5, kind: input, shape index: {}]   ;;  %s494_s6 = inlined_call_operand.vmem [shape: f32[1,128], index: 6, kind: input, shape index: {}]   ;;  %s495_s7 = inlined_call_operand.vmem [shape: f32[8,128], index: 7, kind: output, shape index: {}]  }
   0x1   :  { %s28_s25 = sshll.u32 %s394_s24, 4  ;;  %s370_s28 = scalar_lea.hbm %s493_s5, 512  ;;  %s29_s25 = int_to_ptr.vmem [resolvable:$true] %s28_s25 }
   0x2   :  { %p371_p0 = scmp.ne.s32.totalorder %s493_s5, %s370_s28  ;;  %p374_p1 = scmp.lt.u32.totalorder %s370_s28, %s493_s5 }
   0x4   :  { %p376_p2 = pnand %p374_p1, %p371_p0 }
   0x6   :  { %379 = shalt.err (!%p376_p2)
}
   0x7   :  { %s380_s10 = scalar_lea.vmem %s29_s25, 512  ;;  %p385_p4 = scmp.lt.s32.totalorder %s29_s25, %s29_s25 }
   0x8   :  { %p381_p3 = scmp.ne.s32.totalorder %s29_s25, %s380_s10  ;;  %p386_p5 = scmp.lt.s32.totalorder %s380_s10, %s380_s10 }
   0xa   :  { %p387_p6 = por %p386_p5, %p385_p4 }
   0xc   :  { %p388_p7 = pnand %p387_p6, %p381_p3 }
   0xe   :  { %391 = shalt.err (!%p388_p7)
}
   0xf   :  { %s395_s11 = smov 128   ;;  %s396_s12 = smov 8  }
  0x10   :  { %34 = dma.hbm_to_vmem [thread:$0]  %s493_s5, 512, %s29_s25, [#allocation3], %s395_s11, %s395_s11, %s396_s12  }
  0x11   :  { %392 = dma.done.wait [#allocation3], 512  }
  0x12   :  { %393 = vsyncadd [#allocation3], 4294966784  ;;  %v397_v0 = vmov 0.0|0.0   ;;  %vm398_vm0 = vmmov 0   ;;  %v399_v1 = vmov 0.0   ;;  %v41_v2 = vld [vmem:[%s489_s1] sm:$0xff] }
  0x13   :  { %349 = vmatprep.subr.bf16.mxu0 %v397_v0  ;;  %324 = vmatprep.mubr.msk.f32.mxu0 %vm398_vm0, %v399_v1  ;;  %v42_v3 = vld [vmem:[%s489_s1 + $0x8] sm:$0xff]  ;;  %v125_v5 = vld [vmem:[%s491_s3] sm:$0xff]  ;;  %vm50_vm1 = vcmask 130048   ;;  %v127_v9 = vld [vmem:[%s491_s3 + $0x10] sm:$0xff]  ;;  %vm136_vm2 = vcmask 261120  }
  0x14   :  { %352 = vmatprep.subr.bf16.mxu1 %v397_v0  ;;  %335 = vmatprep.mubr.msk.f32.mxu1 %vm398_vm0, %v399_v1  ;;  %v350_v4 = vpack.c.bf16 %v42_v3, %v41_v2  ;;  %v126_v6 = vld [vmem:[%s491_s3 + $0x8] sm:$0xff]  ;;  %v40_v8 = vld [vmem:[%s488_s0] sm:$0xff]  ;;  %v128_v10 = vld [vmem:[%s491_s3 + $0x18] sm:$0xff] }
  0x15   :  { %v353_v7 = vpack.c.bf16 %v126_v6, %v125_v5  ;;  %v356_v11 = vpack.c.bf16 %v128_v10, %v127_v9  ;;  %v211_v12 = vld [vmem:[#allocation2] sm:$0xff]  ;;  %v212_v13 = vld [vmem:[#allocation2 + $0x8] sm:$0xff]  ;;  %v213_v20 = vld [vmem:[#allocation2 + $0x10] sm:$0xff] }
  0x16   :  { %351 = vmatpush3.bf16.msra.mxu0 %v350_v4  ;;  %v359_v14 = vpack.c.bf16 %v212_v13, %v211_v12  ;;  %v301_v15 = vld [vmem:[%s490_s2] ss:$0 sm:$0xff]  ;;  %v214_v21 = vld [vmem:[#allocation2 + $0x18] sm:$0xff] }
  0x17   :  { %354 = vmatpush3.bf16.msra.mxu1 %v353_v7  ;;  %358 = vmatprep.subr.bf16.mxu0 %v397_v0  ;;  %v362_v22 = vpack.c.bf16 %v214_v21, %v213_v20  ;;  %v303_v23 = vld [vmem:[%s492_s4] ss:$0 sm:$0xff] }
  0x18   :  { %355 = vmatprep.subr.bf16.mxu1 %v397_v0  ;;  %v305_v28 = vld [vmem:[%s494_s6] ss:$0 sm:$0xff] }
  0x19   :  { %325 = vmatmul.mubr.msk.f32.vlgmr.msra.gmra.mrb[0].mxu0 %vm50_vm1, %v40_v8 }
  0x1a   :  { %346 = vmatprep.mubr.msk.f32.mxu0 %vm398_vm0, %v399_v1  ;;  %360 = vmatpush3.bf16.msra.mxu0 %v359_v14 }
  0x1b   :  { %357 = vmatpush3.bf16.msra.mxu1 %v356_v11  ;;  %361 = vmatprep.subr.bf16.mxu0 %v397_v0 }
  0x1e   :  { %363 = vmatpush3.bf16.msra.mxu0 %v362_v22 }
  0xec   :  { %v120_v16 = vpop.f32.mrb[0].mxu0 }
  0xed   :  { %v121_v17 = vadd.f32 %v301_v15, %v120_v16  ;;  %v326_v18 = vpop.f32.mrb[1].mxu0 }
  0xef   :  { %v124_v19 = vmax.f32 %v121_v17, 0.0 }
  0xf1   :  { %336 = vmatmul.mubr.msk.f32.vlgmr.msra.gmra.mrb[0].mxu1 %vm136_vm2, %v124_v19 }
 0x1c4   :  { %v206_v24 = vpop.f32.mrb[0].mxu1 }
 0x1c5   :  { %v207_v25 = vadd.f32 %v303_v23, %v206_v24  ;;  %v337_v26 = vpop.f32.mrb[1].mxu1 }
 0x1c7   :  { %v210_v27 = vmax.f32 %v207_v25, 0.0 }
 0x1c9   :  { %347 = vmatmul.mubr.msk.f32.vlgmr.msra.gmra.mrb[2].mxu0 %vm136_vm2, %v210_v27 }
 0x29c   :  { %v291_v29 = vpop.f32.mrb[2].mxu0 }
 0x29d   :  { %v292_v30 = vadd.f32 %v305_v28, %v291_v29  ;;  %v348_v31 = vpop.f32.mrb[3].mxu0 }
 0x29f   :  { %295 = vst [vmem:[%s495_s7] sm:$0xff] %v292_v30 }
 0x2a0   :  { %300 = vsyncpa [#allocation3], 1 }

</bundles_post_ra>
